<compile_context>
chip_gen: v7x
topology: tpu7x:2x2x1
jax: 0.10.0
libtpu: 0.0.40
codegen_flags: <defaults>
</compile_context>

<pallas_src>
import functools
import math

import numpy as np
import jax
import jax.numpy as jnp
from jax import lax
from jax.experimental import pallas as pl
from jax.experimental.pallas import tpu as pltpu


# --------------------------------------------------------------------------
# host-side helpers (static / trace-time only)
# --------------------------------------------------------------------------
def _round_up(x, m):
    return ((x + m - 1) // m) * m


def _group_indicator(groups, inC, outC):
    """{0,1} indicator of group_mask: 1.0 where the mask is 1, 0.0 where it is alpha.

    Matches the PyTorch group_mask() exactly (g_size = inC // groups on both
    axes; any remainder rows/cols stay at 1.0).  Shape (inC, outC).
    """
    ind = np.ones((inC, outC), np.float32)
    g = inC // groups
    for gx in range(groups):
        for gy in range(groups):
            if gx != gy:
                ind[gx * g:(gx + 1) * g, gy * g:(gy + 1) * g] = 0.0
    return ind


def _banded_weight(w_hwio, W_in, W_out, K, Cin, Cout):
    """Banded (block-Toeplitz) weight for the lane-folded conv.

    B[kh, wi*Cin + ci, wo*Cout + co] = w_hwio[kh, wi - wo, ci, co] if 0<=wi-wo<K else 0
    so that out_fold[h, :] = sum_kh  x_fold[h + kh, :] @ B[kh].
    """
    kw_idx = np.arange(W_in)[:, None] - np.arange(W_out)[None, :]     # (W_in, W_out)
    valid = ((kw_idx >= 0) & (kw_idx < K)).astype(np.float32)
    kw_c = np.clip(kw_idx, 0, K - 1)
    band = w_hwio[:, kw_c, :, :]                                      # (K, W_in, W_out, Cin, Cout)
    band = band * jnp.asarray(valid, band.dtype)[None, :, :, None, None]
    band = jnp.transpose(band, (0, 1, 3, 2, 4))                       # (K, W_in, Cin, W_out, Cout)
    return band.reshape(K, W_in * Cin, W_out * Cout)


# --------------------------------------------------------------------------
# kernels
# --------------------------------------------------------------------------
def _mask_conv2d_banded_kernel(*refs, K, tile_h, use_halo):
    """Lane-folded path: out(1, tile_h, W_out*Cout) = sum_kh x_fold @ B[kh] + b."""
    if use_halo:
        xa_ref, xh_ref, w_ref, b_ref, out_ref = refs
    else:
        xa_ref, w_ref, b_ref, out_ref = refs
        xh_ref = None

    xa = xa_ref[0]                                        # (a_rows, W_in*Cin)
    if use_halo:
        halo = xh_ref[0]                                  # (halo_rows, W_in*Cin)
        xwin = jnp.concatenate([xa, halo[:K - 1]], axis=0)  # (tile_h + K - 1, F)
    else:
        xwin = xa                                         # already tile_h + K - 1 rows

    acc = jnp.dot(xwin[0:tile_h, :], w_ref[0], preferred_element_type=jnp.float32)
    for kh in range(1, K):
        acc = acc + jnp.dot(xwin[kh:kh + tile_h, :], w_ref[kh],
                            preferred_element_type=jnp.float32)
    acc = acc + b_ref[...]                                # (1, W_out*Cout) broadcast
    out_ref[...] = acc[None, :, :].astype(out_ref.dtype)


def _mask_conv2d_general_kernel(*refs, K, tile_h, use_halo):
    """NHWC path for large channel counts: per-tap accumulating matmuls."""
    if use_halo:
        xa_ref, xh_ref, w_ref, b_ref, out_ref = refs
    else:
        xa_ref, w_ref, b_ref, out_ref = refs
        xh_ref = None

    Cin = xa_ref.shape[3]
    W_out = out_ref.shape[2]
    Cout = out_ref.shape[3]

    xa = xa_ref[0]                                        # (a_rows, W_in, Cin)
    if use_halo:
        halo = xh_ref[0]                                  # (halo_rows, W_in, Cin)
        xwin = jnp.concatenate([xa, halo[:K - 1]], axis=0)
    else:
        xwin = xa

    acc = None
    for kh in range(K):
        for kw in range(K):
            patch = xwin[kh:kh + tile_h, kw:kw + W_out, :].reshape(tile_h * W_out, Cin)
            part = jnp.dot(patch, w_ref[kh, kw], preferred_element_type=jnp.float32)
            acc = part if acc is None else acc + part
    acc = acc + b_ref[...]                                # (1, Cout) broadcast
    out_ref[...] = acc.reshape(1, tile_h, W_out, Cout).astype(out_ref.dtype)


# --------------------------------------------------------------------------
# wrapper
# --------------------------------------------------------------------------
def mask_conv2d_forward(x_nhwc, weight, bias, alpha, groups, *,
                        compute_dtype=jnp.float32, tile_h_cap=512, path="auto"):
    """MaskConv2d.forward(inp, alpha) on NHWC activations.

    x_nhwc : (N, H, W, Cin)  with Cin == weight.shape[1]
    weight : (inC, outC, K, K)   -- PyTorch module storage layout
    bias   : (inC,)              -- conv output channels == inC
    """
    N, H_in, W_in, Cin = x_nhwc.shape
    inC, outC, K, K2 = weight.shape
    assert K == K2, "square kernel expected"
    assert Cin == outC, "input channels must equal weight.shape[1] (== module outC)"
    Cout = inC
    H_out, W_out = H_in - K + 1, W_in - K + 1
    F = W_in * Cin                      # folded input lane width
    Mlanes = W_out * Cout               # folded output lane width
    xi = jnp.dtype(compute_dtype).itemsize

    # ---- (1) hoist the group mask: premask the weight ONCE per call ----------
    ind = jnp.asarray(_group_indicator(groups, inC, outC))     # (Cout, Cin) in {0,1}
    alpha_f = jnp.asarray(alpha, jnp.float32)
    scale = ind + (1.0 - ind) * alpha_f                        # 1.0 or alpha
    w_masked = weight.astype(jnp.float32) * scale[:, :, None, None]   # (Cout, Cin, K, K)
    w_hwio = jnp.transpose(w_masked, (2, 3, 1, 0)).astype(compute_dtype)  # (K, K, Cin, Cout)

    # ---- (4) feed compute_dtype activations directly (no f32 detour) ---------
    x = x_nhwc.astype(compute_dtype)

    # ---- path selection: banded (lane-folded, small channels) vs general -----
    if path == "auto":
        path = "banded" if (K * F * Mlanes) <= (1 << 21) else "general"

    # ---- (5)/(6) chip-derived VMEM limit and tile size ------------------------
    try:
        vmem_cap = pltpu.get_tpu_info().vmem_capacity_bytes
    except Exception:  # pragma: no cover - conservative fallback (v7x-sized)
        vmem_cap = 64 * 1024 * 1024
    vmem_limit = int(vmem_cap * 0.75)
    budget = int(vmem_cap * 0.5)        # leave headroom for compiler scratch

    halo_rows = _round_up(K - 1, 8) if K > 1 else 0
    unit = max(8, halo_rows)            # tile_h alignment (sublanes + halo step)

    if path == "banded":
        # 2x double-buffered in, 2x out, window copy + f32 accumulator
        per_row = 2 * F * xi + 2 * Mlanes * 4 + (F + Mlanes) * 4
        fixed = 2 * K * F * Mlanes * xi + 2 * halo_rows * F * xi + 2 * Mlanes * 4
    else:
        per_row = (2 * W_in * Cin * xi + 2 * W_out * Cout * 4
                   + (W_in * Cin + W_out * Cin + W_out * Cout) * 4)
        fixed = 2 * K * K * Cin * Cout * xi + 2 * halo_rows * W_in * Cin * xi + 2 * Cout * 4

    cap = max(unit, (min(tile_h_cap, _round_up(H_out, unit)) // unit) * unit)
    fit = max(unit, ((budget - fixed) // max(per_row, 1) // unit) * unit)
    tile_h = min(cap, fit)

    # ---- (8) pad H so every tile is full (no whole-image fallback cliff) ------
    n_tiles = (H_out + tile_h - 1) // tile_h
    use_halo = (K > 1) and (n_tiles > 1)
    H_out_p = n_tiles * tile_h
    if K == 1:
        H_in_p, a_rows = H_out_p, tile_h
    elif use_halo:
        H_in_p, a_rows = H_out_p + halo_rows, tile_h
    else:                                # single tile, K > 1: main block has the halo
        H_in_p, a_rows = tile_h + K - 1, tile_h + K - 1
    pad_h = H_in_p - H_in
    if pad_h:
        x = jnp.pad(x, ((0, 0), (0, pad_h), (0, 0), (0, 0)))

    if use_halo:
        hstep = tile_h // halo_rows      # integer: tile_h is a multiple of halo_rows

    # ---- BlockSpecs / operands -------------------------------------------------
    if path == "banded":
        x_op = x.reshape(N, H_in_p, F)                               # lane-folded input
        w_op = _banded_weight(w_hwio, W_in, W_out, K, Cin, Cout)     # (K, F, Mlanes)
        b_op = jnp.tile(bias.astype(jnp.float32), W_out).reshape(1, Mlanes)
        kernel = functools.partial(_mask_conv2d_banded_kernel,
                                   K=K, tile_h=tile_h, use_halo=use_halo)
        in_specs = [pl.BlockSpec((1, a_rows, F), lambda n, h: (n, h, 0))]
        operands = [x_op]
        if use_halo:
            in_specs.append(pl.BlockSpec((1, halo_rows, F),
                                         lambda n, h: (n, (h + 1) * hstep, 0)))
            operands.append(x_op)
        in_specs += [pl.BlockSpec((K, F, Mlanes), lambda n, h: (0, 0, 0)),
                     pl.BlockSpec((1, Mlanes), lambda n, h: (0, 0))]
        operands += [w_op, b_op]
        out_spec = pl.BlockSpec((1, tile_h, Mlanes), lambda n, h: (n, h, 0))
        out_shape = jax.ShapeDtypeStruct((N, H_out_p, Mlanes), jnp.float32)
    else:
        x_op = x
        w_op = w_hwio                                                # (K, K, Cin, Cout)
        b_op = bias.astype(jnp.float32).reshape(1, Cout)
        kernel = functools.partial(_mask_conv2d_general_kernel,
                                   K=K, tile_h=tile_h, use_halo=use_halo)
        in_specs = [pl.BlockSpec((1, a_rows, W_in, Cin), lambda n, h: (n, h, 0, 0))]
        operands = [x_op]
        if use_halo:
            in_specs.append(pl.BlockSpec((1, halo_rows, W_in, Cin),
                                         lambda n, h: (n, (h + 1) * hstep, 0, 0)))
            operands.append(x_op)
        in_specs += [pl.BlockSpec((K, K, Cin, Cout), lambda n, h: (0, 0, 0, 0)),
                     pl.BlockSpec((1, Cout), lambda n, h: (0, 0))]
        operands += [w_op, b_op]
        out_spec = pl.BlockSpec((1, tile_h, W_out, Cout), lambda n, h: (n, h, 0, 0))
        out_shape = jax.ShapeDtypeStruct((N, H_out_p, W_out, Cout), jnp.float32)

    # ---- (9) cost estimate so XLA can overlap neighbours -----------------------
    flops = 2 * N * H_out * W_out * K * K * Cin * Cout
    bytes_accessed = int(x_op.size * x_op.dtype.itemsize
                         + w_op.size * jnp.dtype(w_op.dtype).itemsize
                         + b_op.size * 4
                         + N * H_out_p * Mlanes * 4)
    cost = pl.CostEstimate(flops=flops, transcendentals=0,
                           bytes_accessed=bytes_accessed)

    out = pl.pallas_call(
        kernel,
        grid=(N, n_tiles),
        in_specs=in_specs,
        out_specs=out_spec,
        out_shape=out_shape,
        compiler_params=pltpu.CompilerParams(
            dimension_semantics=("parallel", "parallel"),  # independent tiles -> megacore
            vmem_limit_bytes=vmem_limit,
        ),
        cost_estimate=cost,
    )(*operands)

    if path == "banded":
        out = out.reshape(N, H_out_p, W_out, Cout)
    return out[:, :H_out]


# --------------------------------------------------------------------------
# pure-JAX reference (literal port of the PyTorch module, NHWC conv)
# --------------------------------------------------------------------------
def _group_mask_np(groups, alph_value, inC, outC, kernel_size):
    mask = np.ones((inC, outC, kernel_size, kernel_size), np.float32)
    g_size = inC // groups
    for g_x in range(groups):
        for g_y in range(groups):
            for o_x in range(g_size):
                for o_y in range(g_size):
                    if g_x == g_y:
                        mask[g_x * g_size + o_x, g_y * g_size + o_y] = 1.0
                    else:
                        mask[g_x * g_size + o_x, g_y * g_size + o_y] = alph_value
    return mask


def mask_conv2d_ref(x_nhwc, weight, bias, alpha, groups):
    inC, outC, K, _ = weight.shape
    mask = jnp.asarray(_group_mask_np(groups, float(alpha), inC, outC, K))
    mw = weight.astype(jnp.float32) * mask                      # (Cout, Cin, K, K)
    w_hwio = jnp.transpose(mw, (2, 3, 1, 0))                    # (K, K, Cin, Cout)
    out = lax.conv_general_dilated(
        x_nhwc.astype(jnp.float32), w_hwio, (1, 1), "VALID",
        dimension_numbers=("NHWC", "HWIO", "NHWC"),
        precision=lax.Precision.HIGHEST)
    return out + bias.reshape(1, 1, 1, -1)


# --------------------------------------------------------------------------
# main
# --------------------------------------------------------------------------
if __name__ == "__main__":
    # MaskConv2d(inC=8, outC=8, kernel_size=3, groups=2); forward(x, alpha=0.25)
    inC = outC = 8
    K, groups, alpha = 3, 2, 0.25

    key = jax.random.PRNGKey(0)
    kw_, kb_, kx_, kx2_ = jax.random.split(key, 4)
    stdev = 1.0 / math.sqrt(inC * K * K)
    weight = jax.random.uniform(kw_, (inC, outC, K, K), jnp.float32, -stdev, stdev)
    bias = jax.random.uniform(kb_, (outC,), jnp.float32, -stdev, stdev)

    # ---- test A: 2 x 18 x 18 (16x16 valid-conv output) ----
    N, H, W = 2, 18, 18
    # Torch would hand us NCHW; the kernel runs NHWC.  Transpose is test glue
    # only -- in a real model keep activations NHWC end-to-end.
    x_nchw = jax.random.normal(kx_, (N, outC, H, W), jnp.float32)
    x_nhwc = jnp.transpose(x_nchw, (0, 2, 3, 1))
    ref = jax.block_until_ready(mask_conv2d_ref(x_nhwc, weight, bias, alpha, groups))

    # banded lane-folded path, single big tile (default caps)
    out = jax.block_until_ready(
        mask_conv2d_forward(x_nhwc, weight, bias, alpha, groups))
    np.testing.assert_allclose(np.asarray(out), np.asarray(ref), rtol=1e-2, atol=1e-2)

    # banded path, 2 H-tiles -> exercises the halo block + H padding
    out = jax.block_until_ready(
        mask_conv2d_forward(x_nhwc, weight, bias, alpha, groups, tile_h_cap=8))
    np.testing.assert_allclose(np.asarray(out), np.asarray(ref), rtol=1e-2, atol=1e-2)

    # general per-tap path (the large-channel kernel), forced for coverage
    out = jax.block_until_ready(
        mask_conv2d_forward(x_nhwc, weight, bias, alpha, groups,
                            tile_h_cap=8, path="general"))
    np.testing.assert_allclose(np.asarray(out), np.asarray(ref), rtol=1e-2, atol=1e-2)

    # bf16 operands end-to-end (f32 accumulation on the MXU)
    out_bf16 = jax.block_until_ready(
        mask_conv2d_forward(x_nhwc, weight, bias, alpha, groups,
                            compute_dtype=jnp.bfloat16))
    np.testing.assert_allclose(np.asarray(out_bf16), np.asarray(ref),
                               rtol=5e-2, atol=5e-2)

    # ---- test B: odd sizes (H_out=15, W_out=13) -> ragged last tile via padding ----
    N2, H2, W2 = 1, 17, 15
    x2 = jax.random.normal(kx2_, (N2, H2, W2, outC), jnp.float32)
    ref2 = jax.block_until_ready(mask_conv2d_ref(x2, weight, bias, alpha, groups))
    out2 = jax.block_until_ready(
        mask_conv2d_forward(x2, weight, bias, alpha, groups, tile_h_cap=8))
    np.testing.assert_allclose(np.asarray(out2), np.asarray(ref2), rtol=1e-2, atol=1e-2)

    print("KERNEL_OK")
</pallas_src>

<mosaic_0001>
module attributes {stable_mosaic.version = 11 : i64} {
  func.func @_mask_conv2d_banded_kernel(%arg0: i32, %arg1: i32, %arg2: memref<1x18x144xf32, #tpu.memory_space<vmem>>, %arg3: memref<3x144x128xf32, #tpu.memory_space<vmem>>, %arg4: memref<1x128xf32, #tpu.memory_space<vmem>>, %arg5: memref<1x16x128xf32, #tpu.memory_space<vmem>>) attributes {dimension_semantics = [#tpu.dimension_semantics<parallel>, #tpu.dimension_semantics<parallel>], iteration_bounds = array<i64: 2, 1>, scalar_prefetch = 0 : i64, scratch_operands = 0 : i64, tpu.core_type = #tpu.core_type<tc>, window_params = [{transform_indices = @transform_0, window_bounds = array<i64: 1, 18, 144>}, {pipeline_mode = #tpu.pipeline_mode<synchronous>, transform_indices = @transform_1, window_bounds = array<i64: 3, 144, 128>}, {pipeline_mode = #tpu.pipeline_mode<synchronous>, transform_indices = @transform_2, window_bounds = array<i64: 1, 128>}, {transform_indices = @transform_3, window_bounds = array<i64: 1, 16, 128>}]} {
    %c0 = arith.constant 0 : index
    %c0_0 = arith.constant 0 : index
    %c0_1 = arith.constant 0 : index
    %0 = vector.load %arg2[%c0, %c0_0, %c0_1] : memref<1x18x144xf32, #tpu.memory_space<vmem>>, vector<1x18x144xf32>
    %1 = vector.shape_cast %0 : vector<1x18x144xf32> to vector<18x144xf32>
    %2 = vector.extract_strided_slice %1 {offsets = [0, 0], sizes = [16, 144], strides = [1, 1]} : vector<18x144xf32> to vector<16x144xf32>
    %c0_2 = arith.constant 0 : index
    %c0_3 = arith.constant 0 : index
    %c0_4 = arith.constant 0 : index
    %3 = vector.load %arg3[%c0_2, %c0_3, %c0_4] : memref<3x144x128xf32, #tpu.memory_space<vmem>>, vector<1x144x128xf32>
    %4 = vector.shape_cast %3 : vector<1x144x128xf32> to vector<144x128xf32>
    %cst = arith.constant dense<0.000000e+00> : vector<16x128xf32>
    %5 = tpu.matmul %2, %4, %cst {dimension_numbers = #tpu.dot_dimension_numbers<[1], [0], [0], [1], [0, 0, 1, 1], [], []>} : vector<16x144xf32>, vector<144x128xf32>, vector<16x128xf32> -> vector<16x128xf32>
    %6 = vector.extract_strided_slice %1 {offsets = [1, 0], sizes = [16, 144], strides = [1, 1]} : vector<18x144xf32> to vector<16x144xf32>
    %c1 = arith.constant 1 : index
    %c0_5 = arith.constant 0 : index
    %c0_6 = arith.constant 0 : index
    %7 = vector.load %arg3[%c1, %c0_5, %c0_6] : memref<3x144x128xf32, #tpu.memory_space<vmem>>, vector<1x144x128xf32>
    %8 = vector.shape_cast %7 : vector<1x144x128xf32> to vector<144x128xf32>
    %cst_7 = arith.constant dense<0.000000e+00> : vector<16x128xf32>
    %9 = tpu.matmul %6, %8, %cst_7 {dimension_numbers = #tpu.dot_dimension_numbers<[1], [0], [0], [1], [0, 0, 1, 1], [], []>} : vector<16x144xf32>, vector<144x128xf32>, vector<16x128xf32> -> vector<16x128xf32>
    %10 = arith.addf %5, %9 : vector<16x128xf32>
    %11 = vector.extract_strided_slice %1 {offsets = [2, 0], sizes = [16, 144], strides = [1, 1]} : vector<18x144xf32> to vector<16x144xf32>
    %c2 = arith.constant 2 : index
    %c0_8 = arith.constant 0 : index
    %c0_9 = arith.constant 0 : index
    %12 = vector.load %arg3[%c2, %c0_8, %c0_9] : memref<3x144x128xf32, #tpu.memory_space<vmem>>, vector<1x144x128xf32>
    %13 = vector.shape_cast %12 : vector<1x144x128xf32> to vector<144x128xf32>
    %cst_10 = arith.constant dense<0.000000e+00> : vector<16x128xf32>
    %14 = tpu.matmul %11, %13, %cst_10 {dimension_numbers = #tpu.dot_dimension_numbers<[1], [0], [0], [1], [0, 0, 1, 1], [], []>} : vector<16x144xf32>, vector<144x128xf32>, vector<16x128xf32> -> vector<16x128xf32>
    %15 = arith.addf %10, %14 : vector<16x128xf32>
    %c0_11 = arith.constant 0 : index
    %c0_12 = arith.constant 0 : index
    %16 = vector.load %arg4[%c0_11, %c0_12] : memref<1x128xf32, #tpu.memory_space<vmem>>, vector<1x128xf32>
    %17 = vector.broadcast %16 : vector<1x128xf32> to vector<16x128xf32>
    %18 = arith.addf %15, %17 : vector<16x128xf32>
    %19 = vector.shape_cast %18 : vector<16x128xf32> to vector<1x16x128xf32>
    %c0_13 = arith.constant 0 : index
    %c0_14 = arith.constant 0 : index
    %c0_15 = arith.constant 0 : index
    %20 = vector.load %arg5[%c0_13, %c0_14, %c0_15] : memref<1x16x128xf32, #tpu.memory_space<vmem>>, vector<1x16x128xf32>
    tpu.vector_store %arg5[%c0_13, %c0_14, %c0_15], %19 {strides = array<i32>} : memref<1x16x128xf32, #tpu.memory_space<vmem>>, vector<1x16x128xf32>,
    return
  }
  func.func @transform_0(%arg0: i32, %arg1: i32) -> (i32, i32, i32) {
    %c0_i32 = arith.constant 0 : i32
    %c0_i32_0 = arith.constant 0 : i32
    return %arg0, %arg1, %c0_i32 : i32, i32, i32
  }
  func.func @transform_1(%arg0: i32, %arg1: i32) -> (i32, i32, i32) {
    %c0_i32 = arith.constant 0 : i32
    %c0_i32_0 = arith.constant 0 : i32
    %c0_i32_1 = arith.constant 0 : i32
    %c0_i32_2 = arith.constant 0 : i32
    return %c0_i32, %c0_i32_0, %c0_i32_1 : i32, i32, i32
  }
  func.func @transform_2(%arg0: i32, %arg1: i32) -> (i32, i32) {
    %c0_i32 = arith.constant 0 : i32
    %c0_i32_0 = arith.constant 0 : i32
    %c0_i32_1 = arith.constant 0 : i32
    return %c0_i32, %c0_i32_0 : i32, i32
  }
  func.func @transform_3(%arg0: i32, %arg1: i32) -> (i32, i32, i32) {
    %c0_i32 = arith.constant 0 : i32
    %c0_i32_0 = arith.constant 0 : i32
    return %arg0, %arg1, %c0_i32 : i32, i32, i32
  }
}

</mosaic_0001>

<bundles_post_ra>
// kernel: tpu_custom_call.1
= control target key start
LH: loop header
LB: loop body
LE: loop exit
PB: predicated region body
PF: predicated region fallthrough
CT: control target
= control target key end

     0   :  { %8 = vsyncpa [#allocation3], 0  ;;  %s1247_s0 = inlined_call_operand.vmem [shape: f32[2,18,144], index: 0, kind: input, shape index: {}]   ;;  %s1248_s1 = inlined_call_operand.hbm [shape: f32[3,144,128], index: 1, kind: input, shape index: {}]   ;;  %s1249_s2 = inlined_call_operand.vmem [shape: f32[1,128], index: 2, kind: input, shape index: {}]   ;;  %s1250_s3 = inlined_call_operand.hbm [shape: f32[2,16,128], index: 3, kind: output, shape index: {}]  }
   0x1   :  { %9 = vsyncpa [#allocation4], 0 }
   0x2   :  { %11 = vsyncpa [#allocation4 + $0x1], 0  ;;  %s1005_s12 = smov 0   ;;  %s1007_s13 = smov 0  }
   0x3   :  { %s1009_s14 = smov 0   ;;  %s1011_s15 = smov 0  }
   0x4   :  { %s1013_s16 = smov 0   ;;  %s1015_s17 = smov 0  }
   0x5 LB: > { %s673_s18 = sadd.s32 4294967295, %s976_s17   ;;  %s674_s19 = sadd.s32 4294967294, %s976_s17   ;;  %s976_s17 = sphi %s1015_s17, %s17_s17   ;;  %s972_s16 = sphi %s1013_s16, %s1268_s16   ;;  %s968_s15 = sphi %s1011_s15, %s1267_s15   ;;  %s964_s14 = sphi %s1009_s14, %s1266_s14   ;;  %s960_s13 = sphi %s1007_s13, %s1265_s13   ;;  %s956_s12 = sphi %s1005_s12, %s1264_s12  }
   0x6   : > { %s29_s20 = sadd.s32 1, %s972_s16  ;;  %s108_s21 = sadd.s32 1, %s964_s14 }
   0x7   : > { %p31_p0 = scmp.ge.s32.totalorder %s29_s20, 2  ;;  %p118_p1 = scmp.ne.s32.totalorder %s964_s14, %s960_s13 }
   0x8   : > { %p119_p2 = scmp.eq.s32.totalorder %s673_s18, 1  ;;  %p124_p3 = scmp.ne.s32.totalorder %s960_s13, %s956_s12 }
   0x9   : > { %s1270_s20 = smov (%p31_p0, %s29_s20), 0  ;;  %p125_p5 = scmp.eq.s32.totalorder %s674_s19, 1 }
   0xa   : > { %p1045_p4 = por %p119_p2, %p118_p1  ;;  %s103_s23 = ssub.s32 %s972_s16, %s1270_s20 }
   0xb   : > { %p675_p6 = scmp.ge.s32.totalorder %s976_s17, 1  ;;  %p106_p7 = scmp.eq.s32.totalorder %s103_s23, 0 }
   0xc   : > { %s1255_s22 = scalar_select %p1045_p4, 1, 0 }
   0xd   : > { %p1052_p8 = por %p125_p5, %p124_p3  ;;  %p132_p9 = scmp.lt.s32.totalorder %s976_s17, 3 }
   0xe   : > { %s1058_s25 = scalar_select %p106_p7, %s964_s14, %s108_s21  }
   0xf   : > { %s1256_s24 = scalar_select %p1052_p8, 1, 0 }
  0x10   : > { %p1060_p10 = pnand %p675_p6, %p132_p9  ;;  %p1064_p11 = scmp.eq.s32.totalorder %s673_s18, 0 }
  0x11   : > { %s978_s28 = smov [#allocation2]   ;;  %s866_s6 = scalar_lea.hbm %s1248_s1, 6912 }
  0x12   : > { %s1257_s26 = scalar_select %p1060_p10, 1, 0 }
  0x13   : > { %s1258_s27 = scalar_select %p1064_p11, 1, 0 }
  0x14   : > { %p801_p12 = pneg %p1060_p10  ;;  %s144_s29 = sshll.u32 %s978_s28, 4  ;;  %s145_s29 = int_to_ptr.vmem [resolvable:$true] %s144_s29 }
  0x15   : > { %p867_p0 = scmp.ne.s32.totalorder %s1248_s1, %s866_s6  ;;  %p873_p5 = scmp.lt.u32.totalorder %s866_s6, %s1248_s1 }
  0x16   : > { %p1072_p13 = pnand %p1064_p11, %p801_p12 }
  0x18   : > { %p868_p1 = pneg %p1072_p13 }
  0x1a   : > { %p869_p2 = pnand %p868_p1, %p867_p0 }
  0x1c   : > { %p870_p3 = pneg %p869_p2 }
  0x1e   : > { %p875_p6 = pnand %p873_p5, %p870_p3 }
  0x20   : > { %878 = shalt.err (!%p875_p6)
}
  0x21   : > { %s879_s11 = scalar_lea.vmem %s145_s29, 6912  ;;  %p887_p8 = scmp.lt.s32.totalorder %s145_s29, %s145_s29 }
  0x22   : > { %p880_p7 = scmp.ne.s32.totalorder %s145_s29, %s879_s11  ;;  %p888_p4 = scmp.lt.s32.totalorder %s879_s11, %s879_s11 }
  0x24   : > { %p882_p9 = pnand %p880_p7, %p868_p1  ;;  %p889_p11 = por %p888_p4, %p887_p8 }
  0x26   : > { %p883_p12 = pneg %p882_p9 }
  0x28   : > { %p890_p10 = pnand %p889_p11, %p883_p12 }
  0x2a   : > { %893 = shalt.err (!%p890_p10)
}
  0x2b   : > { %s979_s18 = smov 128   ;;  %s980_s19 = smov 8  }
  0x2c   : > { %804 = dma.hbm_to_vmem [thread:$0]  (!%p1072_p13), %s1248_s1, 6912, %s145_s29, [#allocation3], %s979_s18, %s979_s18, %s980_s19  }
  0x2d   : > { %p1260_p0 = scmp.ne.s32.totalorder %s1257_s26, 0 }
  0x2e   : > { %p1261_p2 = scmp.ne.s32.totalorder (!%p1260_p0), %s1258_s27, 0 }
  0x2f   : > { %177 = sbr.rel (%p1260_p0) target bundleno = 361 (0x169), region = 32 }
  0x36   : > { %947 = dma.done.wait (%p1261_p2), [#allocation3], 6912  }
  0x37   : > { %949 = vsyncadd (%p1261_p2), [#allocation3], 4294960384  ;;  %v981_v0 = vmov 0.0|0.0   ;;  %p207_p4 = scmp.lt.s32.totalorder %s968_s15, 1  ;;  %v243_v1 = vld [vmem:[#allocation2 + $0x90] sm:$0xff]  ;;  %v244_v2 = vld [vmem:[#allocation2 + $0x98] sm:$0xff] }
  0x38   : > { %695 = vmatprep.subr.bf16.mxu0 %v981_v0  ;;  %722 = vmatprep.subr.bf16.mxu1 %v981_v0  ;;  %v224_v3 = vld [vmem:[#allocation2] sm:$0xff]  ;;  %v696_v4 = vpack.c.bf16 %v244_v2, %v243_v1  ;;  %v225_v5 = vld [vmem:[#allocation2 + $0x8] sm:$0xff]  ;;  %v226_v9 = vld [vmem:[#allocation2 + $0x10] sm:$0xff]  ;;  %vm280_vm0 = vcmask 130048   ;;  %vm267_vm1 = vcmask 1046528   ;;  %vm458_vm2 = vcmask 1045504  }
  0x39   : > { %v245_v6 = vld [vmem:[#allocation2 + $0xa0] sm:$0xff]  ;;  %v246_v7 = vld [vmem:[#allocation2 + $0xa8] sm:$0xff]  ;;  %s208_s26 = scalar_select %p207_p4, %s968_s15, 1  ;;  %v723_v8 = vpack.c.bf16 %v225_v5, %v224_v3  ;;  %v227_v10 = vld [vmem:[#allocation2 + $0x18] sm:$0xff] }
  0x3a   : > { %697 = vmatpush1.bf16.msra.mxu0 %v696_v4  ;;  %v699_v11 = vpack.c.bf16 %v246_v7, %v245_v6  ;;  %v726_v12 = vpack.c.bf16 %v227_v10, %v226_v9  ;;  %v247_v13 = vld [vmem:[#allocation2 + $0xb0] sm:$0xff]  ;;  %v248_v14 = vld [vmem:[#allocation2 + $0xb8] sm:$0xff]  ;;  %v228_v15 = vld [vmem:[#allocation2 + $0x20] sm:$0xff]  ;;  %s203_s4 = sand.u32 1, %s960_s13   ;;  %s694_s10 = sshll.u32 %s968_s15, 8 }
  0x3b   : > { %724 = vmatpush1.bf16.msra.mxu1 %v723_v8  ;;  %698 = vmatprep.subr.bf16.mxu0 %v981_v0  ;;  %v229_v16 = vld [vmem:[#allocation2 + $0x28] sm:$0xff]  ;;  %s794_s27 = smul.u32 48, %s208_s26  ;;  %v702_v17 = vpack.c.bf16 %v248_v14, %v247_v13  ;;  %v249_v19 = vld [vmem:[#allocation2 + $0xc0] sm:$0xff]  ;;  %v230_v21 = vld [vmem:[#allocation2 + $0x30] sm:$0xff]  ;;  %s680_s5 = sshll.u32 %s203_s4, 4 }
  0x3c   : > { %725 = vmatprep.subr.bf16.mxu1 %v981_v0  ;;  %v729_v18 = vpack.c.bf16 %v229_v16, %v228_v15  ;;  %v250_v20 = vld [vmem:[#allocation2 + $0xc8] sm:$0xff]  ;;  %v231_v22 = vld [vmem:[#allocation2 + $0x38] sm:$0xff]  ;;  %v251_v24 = vld [vmem:[#allocation2 + $0xd0] sm:$0xff]  ;;  %s205_s8 = scalar_lea.vmem [#allocation5], %s680_s5  ;;  %s1199_s19 = scalar_lea.hbm %s1250_s3, %s694_s10 }
  0x3d   : > { %s1109_s30 = scalar_lea.vmem %s1247_s0, %s794_s27  ;;  %v705_v23 = vpack.c.bf16 %v250_v20, %v249_v19  ;;  %v732_v25 = vpack.c.bf16 %v231_v22, %v230_v21  ;;  %v252_v26 = vld [vmem:[#allocation2 + $0xd8] sm:$0xff]  ;;  %v232_v29 = vld [vmem:[#allocation2 + $0x40] sm:$0xff]  ;;  %v233_v30 = vld [vmem:[#allocation2 + $0x48] sm:$0xff]  ;;  %s579_s9 = sshll.u32 %s205_s8, 4  ;;  %s1194_s9 = int_to_ptr.vmem [resolvable:$true] %s579_s9 }
  0x3e   : > { %700 = vmatpush1.bf16.msra.mxu0 %v699_v11  ;;  %v1113_v27 = vld [vmem:[%s1109_s30 + $0x8] sm:$0xff]  ;;  %v1116_v28 = vld [vmem:[%s1109_s30 + $0x18] sm:$0xff]  ;;  %v708_v33 = vpack.c.bf16 %v252_v26, %v251_v24  ;;  %v735_v35 = vpack.c.bf16 %v233_v30, %v232_v29  ;;  %v253_v36 = vld [vmem:[#allocation2 + $0xe0] sm:$0xff]  ;;  %s1201_s15 = scalar_lea.sflag [#allocation4], %s203_s4  ;;  %s894_s21 = scalar_lea.vmem %s1194_s9, 256 }
  0x3f   : > { %727 = vmatpush1.bf16.msra.mxu1 %v726_v12  ;;  %701 = vmatprep.subr.bf16.mxu0 %v981_v0  ;;  %v271_v31 = vrot.slane %v1113_v27, 1  ;;  %v272_v32 = vrot.slane %v1116_v28, 1  ;;  %v254_v37 = vld [vmem:[#allocation2 + $0xe8] sm:$0xff]  ;;  %v234_v38 = vld [vmem:[#allocation2 + $0x50] sm:$0xff]  ;;  %v235_v39 = vld [vmem:[#allocation2 + $0x58] sm:$0xff]  ;;  %v462_v12 = vrot.slane %v1113_v27, 2  ;;  %p895_p8 = scmp.ne.s32.totalorder %s1194_s9, %s894_s21 }
  0x40   : > { %728 = vmatprep.subr.bf16.mxu1 %v981_v0  ;;  %684 = vmatprep.mubr.msk.f32.mxu1 %vm280_vm0, %v1113_v27  ;;  %v711_v40 = vpack.c.bf16 %v254_v37, %v253_v36  ;;  %v738_v41 = vpack.c.bf16 %v235_v39, %v234_v38  ;;  %v255_v42 = vld [vmem:[#allocation2 + $0xf0] sm:$0xff]  ;;  %v256_v43 = vld [vmem:[#allocation2 + $0xf8] sm:$0xff]  ;;  %v236_v44 = vld [vmem:[#allocation2 + $0x60] sm:$0xff]  ;;  %v463_v13 = vrot.slane %v1116_v28, 2  ;;  %p1262_p10 = scmp.ne.s32.totalorder %s1255_s22, 0  ;;  %s982_s23 = smov [#allocation5]  }
  0x41   : > { %v273_v34 = vsel %vm267_vm1, %v271_v31, %v272_v32  ;;  %v237_v45 = vld [vmem:[#allocation2 + $0x68] sm:$0xff]  ;;  %v714_v46 = vpack.c.bf16 %v256_v43, %v255_v42  ;;  %v257_v48 = vld [vmem:[#allocation2 + $0x100] sm:$0xff]  ;;  %v238_v50 = vld [vmem:[#allocation2 + $0x70] sm:$0xff]  ;;  %s898_s26 = sshll.u32 %s982_s23, 4  ;;  %s899_s26 = int_to_ptr.vmem [resolvable:$false] %s898_s26 }
  0x42   : > { %703 = vmatpush1.bf16.msra.mxu0 %v702_v17  ;;  %682 = vmatprep.mubr.msk.f32.mxu0 %vm280_vm0, %v273_v34  ;;  %v741_v47 = vpack.c.bf16 %v237_v45, %v236_v44  ;;  %v258_v49 = vld [vmem:[#allocation2 + $0x108] sm:$0xff]  ;;  %v239_v51 = vld [vmem:[#allocation2 + $0x78] sm:$0xff]  ;;  %v259_v53 = vld [vmem:[#allocation2 + $0x110] sm:$0xff]  ;;  %v464_v19 = vsel %vm458_vm2, %v462_v12, %v463_v13  ;;  %p896_p11 = pnand %p895_p8, %p1262_p10  ;;  %s900_s27 = scalar_lea.vmem %s899_s26, 512 }
  0x43   : > { %730 = vmatpush1.bf16.msra.mxu1 %v729_v18  ;;  %704 = vmatprep.subr.bf16.mxu0 %v981_v0  ;;  %v717_v52 = vpack.c.bf16 %v258_v49, %v257_v48  ;;  %v744_v54 = vpack.c.bf16 %v239_v51, %v238_v50  ;;  %v260_v55 = vld [vmem:[#allocation2 + $0x118] sm:$0xff]  ;;  %v1135_v56 = vld [vmem:[%s1109_s30] sm:$0xff]  ;;  %v1138_v57 = vld [vmem:[%s1109_s30 + $0x10] sm:$0xff]  ;;  %p901_p1 = scmp.lt.s32.totalorder %s1194_s9, %s899_s26  ;;  %p902_p3 = scmp.lt.s32.totalorder %s900_s27, %s894_s21 }
  0x44   : > { %731 = vmatprep.subr.bf16.mxu1 %v981_v0  ;;  %v240_v58 = vld [vmem:[#allocation2 + $0x80] sm:$0xff]  ;;  %v241_v59 = vld [vmem:[#allocation2 + $0x88] sm:$0xff]  ;;  %v720_v60 = vpack.c.bf16 %v260_v55, %v259_v53  ;;  %v268_v61 = vrot.slane %v1135_v56, 1  ;;  %v269_v62 = vrot.slane %v1138_v57, 1  ;;  %v442_v9 = vld [vmem:[#allocation2 + $0x130] sm:$0xff]  ;;  %p897_p13 = pneg %p896_p11 }
  0x45   : > { %v223_v63 = vld [vmem:[%s1109_s30 + $0x28] sm:$0x3]  ;;  %v747_v1 = vpack.c.bf16 %v241_v59, %v240_v58  ;;  %v440_v2 = vld [vmem:[#allocation2 + $0x120] sm:$0xff]  ;;  %v443_v10 = vld [vmem:[#allocation2 + $0x138] sm:$0xff]  ;;  %p903_p5 = por %p902_p3, %p901_p1 }
  0x46   : > { %706 = vmatpush1.bf16.msra.mxu0 %v705_v23  ;;  %v441_v3 = vld [vmem:[#allocation2 + $0x128] sm:$0xff]  ;;  %v1146_v4 = vld [vmem:[%s1109_s30 + $0x20] sm:$0x3]  ;;  %v276_v5 = vrot.slane %v223_v63, 1  ;;  %v270_v6 = vsel %vm267_vm1, %v268_v61, %v269_v62  ;;  %v753_v14 = vpack.c.bf16 %v443_v10, %v442_v9  ;;  %v467_v16 = vrot.slane %v223_v63, 2  ;;  %v446_v22 = vld [vmem:[#allocation2 + $0x150] sm:$0xff] }
  0x47   : > { %733 = vmatpush1.bf16.msra.mxu1 %v732_v25  ;;  %707 = vmatprep.subr.bf16.mxu0 %v981_v0  ;;  %v750_v7 = vpack.c.bf16 %v441_v3, %v440_v2  ;;  %v274_v8 = vrot.slane %v1146_v4, 1  ;;  %v444_v17 = vld [vmem:[#allocation2 + $0x140] sm:$0xff]  ;;  %v445_v18 = vld [vmem:[#allocation2 + $0x148] sm:$0xff]  ;;  %v447_v23 = vld [vmem:[#allocation2 + $0x158] sm:$0xff]  ;;  %v465_v42 = vrot.slane %v1146_v4, 2  ;;  %p904_p6 = pnand %p903_p5, %p897_p13 }
  0x48   : > { %734 = vmatprep.subr.bf16.mxu1 %v981_v0  ;;  %v277_v11 = vsel %vm267_vm1, %v272_v32, %v276_v5  ;;  %v756_v20 = vpack.c.bf16 %v445_v18, %v444_v17  ;;  %v468_v21 = vsel %vm458_vm2, %v463_v13, %v467_v16  ;;  %v759_v24 = vpack.c.bf16 %v447_v23, %v446_v22  ;;  %v448_v25 = vld [vmem:[#allocation2 + $0x160] sm:$0xff]  ;;  %v449_v26 = vld [vmem:[#allocation2 + $0x168] sm:$0xff]  ;;  %v451_v29 = vld [vmem:[#allocation2 + $0x178] sm:$0xff] }
  0x49   : > { %v275_v15 = vsel %vm267_vm1, %v269_v62, %v274_v8  ;;  %v762_v27 = vpack.c.bf16 %v449_v26, %v448_v25  ;;  %v452_v31 = vld [vmem:[#allocation2 + $0x180] sm:$0xff]  ;;  %v453_v32 = vld [vmem:[#allocation2 + $0x188] sm:$0xff]  ;;  %v454_v34 = vld [vmem:[#allocation2 + $0x190] sm:$0xff] }
  0x4a   : > { %709 = vmatpush1.bf16.msra.mxu0 %v708_v33  ;;  %v768_v33 = vpack.c.bf16 %v453_v32, %v452_v31  ;;  %v456_v37 = vld [vmem:[#allocation2 + $0x1a0] sm:$0xff]  ;;  %v457_v38 = vld [vmem:[#allocation2 + $0x1a8] sm:$0xff] }
  0x4b   : > { %736 = vmatpush1.bf16.msra.mxu1 %v735_v35  ;;  %710 = vmatprep.subr.bf16.mxu0 %v981_v0  ;;  %v455_v35 = vld [vmem:[#allocation2 + $0x198] sm:$0xff]  ;;  %v774_v39 = vpack.c.bf16 %v457_v38, %v456_v37  ;;  %v688_v55 = vld [vmem:[%s1249_s2] ss:$0 sm:$0xff] }
  0x4c   : > { %737 = vmatprep.subr.bf16.mxu1 %v981_v0  ;;  %v771_v36 = vpack.c.bf16 %v455_v35, %v454_v34 }
  0x4e   : > { %712 = vmatpush1.bf16.msra.mxu0 %v711_v40  ;;  %v459_v40 = vrot.slane %v1135_v56, 2 }
  0x4f   : > { %739 = vmatpush1.bf16.msra.mxu1 %v738_v41  ;;  %713 = vmatprep.subr.bf16.mxu0 %v981_v0  ;;  %v460_v41 = vrot.slane %v1138_v57, 2 }
  0x50   : > { %740 = vmatprep.subr.bf16.mxu1 %v981_v0 }
  0x51   : > { %v461_v43 = vsel %vm458_vm2, %v459_v40, %v460_v41  ;;  %v466_v44 = vsel %vm458_vm2, %v460_v41, %v465_v42 }
  0x52   : > { %715 = vmatpush1.bf16.msra.mxu0 %v714_v46 }
  0x53   : > { %742 = vmatpush1.bf16.msra.mxu1 %v741_v47  ;;  %716 = vmatprep.subr.bf16.mxu0 %v981_v0 }
  0x54   : > { %743 = vmatprep.subr.bf16.mxu1 %v981_v0 }
  0x56   : > { %718 = vmatpush1.bf16.msra.mxu0 %v717_v52 }
  0x57   : > { %745 = vmatpush1.bf16.msra.mxu1 %v744_v54  ;;  %719 = vmatprep.subr.bf16.mxu0 %v981_v0 }
  0x58   : > { %746 = vmatprep.subr.bf16.mxu1 %v981_v0 }
  0x5a   : > { %721 = vmatpush1.bf16.msra.mxu0 %v720_v60 }
  0x5b   : > { %748 = vmatpush1.bf16.msra.mxu1 %v747_v1  ;;  %749 = vmatprep.subr.bf16.mxu0 %v981_v0 }
  0x5c   : > { %776 = vmatprep.subr.bf16.mxu1 %v981_v0 }
  0x5d   : > { %350 = vmatmul.mubr.f32.vlgmr.msra.gmra.mrb[0].mxu0 %v270_v6 }
  0x5e   : > { %429 = vmatmul.mubr.f32.vlgmr.msra.gmra.mrb[0].mxu1 %v1135_v56  ;;  %751 = vmatpush1.bf16.msra.mxu0 %v750_v7 }
  0x5f   : > { %785 = vmatpush1.bf16.msra.mxu1 %v750_v7  ;;  %752 = vmatprep.subr.bf16.mxu0 %v981_v0 }
  0x60   : > { %777 = vmatprep.subr.bf16.mxu1 %v981_v0  ;;  %683 = vmatprep.mubr.msk.f32.mxu0 %vm280_vm0, %v277_v11 }
  0x61   : > { %685 = vmatprep.mubr.msk.f32.mxu1 %vm280_vm0, %v1116_v28  ;;  %355 = vmatmul.mubr.f32.gmra.mrb[2].mxu0 %v275_v15  ;;  %v450_v28 = vld [vmem:[#allocation2 + $0x170] sm:$0xff] }
  0x62   : > { %754 = vmatpush1.bf16.msra.mxu0 %v753_v14  ;;  %434 = vmatmul.mubr.f32.gmra.mrb[2].mxu1 %v1138_v57  ;;  %v765_v30 = vpack.c.bf16 %v451_v29, %v450_v28 }
  0x63   : > { %786 = vmatpush1.bf16.msra.mxu1 %v753_v14  ;;  %755 = vmatprep.subr.bf16.mxu0 %v981_v0 }
  0x64   : > { %778 = vmatprep.subr.bf16.mxu1 %v981_v0  ;;  %686 = vmatprep.mubr.msk.f32.mxu0 %vm280_vm0, %v464_v19 }
  0x65   : > { %687 = vmatprep.mubr.msk.f32.mxu1 %vm280_vm0, %v468_v21 }
  0x66   : > { %757 = vmatpush1.bf16.msra.mxu0 %v756_v20 }
  0x67   : > { %787 = vmatpush1.bf16.msra.mxu1 %v756_v20  ;;  %758 = vmatprep.subr.bf16.mxu0 %v981_v0 }
  0x68   : > { %779 = vmatprep.subr.bf16.mxu1 %v981_v0 }
  0x6a   : > { %760 = vmatpush1.bf16.msra.mxu0 %v759_v24 }
  0x6b   : > { %788 = vmatpush1.bf16.msra.mxu1 %v759_v24  ;;  %761 = vmatprep.subr.bf16.mxu0 %v981_v0 }
  0x6c   : > { %780 = vmatprep.subr.bf16.mxu1 %v981_v0 }
  0x6e   : > { %763 = vmatpush1.bf16.msra.mxu0 %v762_v27 }
  0x6f   : > { %789 = vmatpush1.bf16.msra.mxu1 %v762_v27  ;;  %764 = vmatprep.subr.bf16.mxu0 %v981_v0 }
  0x70   : > { %781 = vmatprep.subr.bf16.mxu1 %v981_v0 }
  0x72   : > { %766 = vmatpush1.bf16.msra.mxu0 %v765_v30 }
  0x73   : > { %790 = vmatpush1.bf16.msra.mxu1 %v765_v30  ;;  %767 = vmatprep.subr.bf16.mxu0 %v981_v0 }
  0x74   : > { %782 = vmatprep.subr.bf16.mxu1 %v981_v0 }
  0x76   : > { %769 = vmatpush1.bf16.msra.mxu0 %v768_v33 }
  0x77   : > { %791 = vmatpush1.bf16.msra.mxu1 %v768_v33  ;;  %770 = vmatprep.subr.bf16.mxu0 %v981_v0 }
  0x78   : > { %783 = vmatprep.subr.bf16.mxu1 %v981_v0 }
  0x7a   : > { %772 = vmatpush1.bf16.msra.mxu0 %v771_v36 }
  0x7b   : > { %792 = vmatpush1.bf16.msra.mxu1 %v771_v36  ;;  %773 = vmatprep.subr.bf16.mxu0 %v981_v0 }
  0x7c   : > { %784 = vmatprep.subr.bf16.mxu1 %v981_v0 }
  0x7e   : > { %775 = vmatpush1.bf16.msra.mxu0 %v774_v39 }
  0x7f   : > { %793 = vmatpush1.bf16.msra.mxu1 %v774_v39 }
  0x81   : > { %540 = vmatmul.mubr.f32.vlgmr.msra.gmra.mrb[4].mxu0 %v461_v43 }
  0x82   : > { %545 = vmatmul.mubr.f32.vlgmr.msra.gmra.mrb[4].mxu1 %v466_v44 }
 0x130   : > { %v351_v45 = vpop.f32.mrb[0].mxu0 }
 0x131   : > { %v430_v46 = vpop.f32.mrb[0].mxu1  ;;  %v353_v47 = vpop.f32.mrb[1].mxu0 }
 0x132   : > { %v431_v48 = vadd.f32 %v430_v46, %v351_v45  ;;  %v432_v49 = vpop.f32.mrb[1].mxu1 }
 0x134   : > { %v356_v50 = vpop.f32.mrb[2].mxu0 }
 0x135   : > { %v435_v51 = vpop.f32.mrb[2].mxu1  ;;  %v358_v52 = vpop.f32.mrb[3].mxu0 }
 0x136   : > { %v436_v53 = vadd.f32 %v435_v51, %v356_v50  ;;  %v437_v0 = vpop.f32.mrb[3].mxu1 }
 0x154   : > { %v541_v54 = vpop.f32.mrb[4].mxu0 }
 0x155   : > { %v550_v56 = vadd.f32 %v541_v54, %v431_v48  ;;  %v546_v57 = vpop.f32.mrb[4].mxu1  ;;  %v543_v58 = vpop.f32.mrb[5].mxu0 }
 0x156   : > { %v551_v59 = vadd.f32 %v546_v57, %v436_v53  ;;  %v548_v60 = vpop.f32.mrb[5].mxu1 }
 0x157   : > { %v559_v61 = vadd.f32 %v688_v55, %v550_v56 }
 0x158   : > { %v560_v62 = vadd.f32 %v688_v55, %v551_v59 }
 0x159   : > { %561 = vst [vmem:[%s205_s8] sm:$0xff] %v559_v61 }
 0x15a   : > { %562 = vst [vmem:[%s205_s8 + $0x8] sm:$0xff] %v560_v62 }
 0x15b   : > { %907 = shalt.err (!%p904_p6)
}
 0x15c   : > { %s908_s28 = scalar_lea.hbm %s1199_s19, 256  ;;  %s912_s4 = scalar_lea.hbm %s1250_s3, 512 }
 0x15d   : > { %p909_p7 = scmp.ne.s32.totalorder %s1199_s19, %s908_s28  ;;  %p913_p0 = scmp.lt.u32.totalorder %s1199_s19, %s1250_s3 }
 0x15e   : > { %p914_p2 = scmp.lt.u32.totalorder %s912_s4, %s908_s28  ;;  %p916_p8 = scmp.lt.u32.totalorder %s908_s28, %s1199_s19 }
 0x15f   : > { %p910_p9 = pnand %p909_p7, %p1262_p10 }
 0x160   : > { %p915_p4 = por %p914_p2, %p913_p0 }
 0x161   : > { %p911_p12 = pneg %p910_p9 }
 0x162   : > { %p917_p11 = por %p916_p8, %p915_p4 }
 0x164   : > { %p918_p13 = pnand %p917_p11, %p911_p12 }
 0x166   : > { %921 = shalt.err (!%p918_p13)
}
 0x167   : > { %s983_s7 = smov 128   ;;  %s984_s8 = smov 8  }
 0x168   : > { %799 = dma.vmem_to_hbm [thread:$0]  (%p1262_p10), %s1194_s9, 256, %s1199_s19, %s1201_s15, %s983_s7, %s983_s7, %s984_s8  }
 0x169 PF: > { %p811_p1 = scmp.ge.s32.totalorder %s976_s17, 2  ;;  %s594_s10 = sand.u32 1, %s956_s12  }
 0x16a   : > { %p1263_p3 = scmp.ne.s32.totalorder %s1256_s24, 0  ;;  %s595_s11 = scalar_lea.sflag [#allocation4], %s594_s10 }
 0x16c   : > { %p806_p5 = pnand %p811_p1, %p1263_p3 }
 0x16e   : > { %951 = dma.done.wait (!%p806_p5), %s595_s11, 256  }
 0x16f   : > { %953 = vsyncadd (!%p806_p5), %s595_s11, 4294967040  ;;  %s17_s17 = sadd.s32 1, %s976_s17   ;;  %s1264_s12 = smov %s960_s13 }
 0x170   : > { %p14_p6 = scmp.ge.s32.totalorder %s17_s17, 4   ;;  %s1265_s13 = smov %s964_s14 }
 0x171   : > { %s1266_s14 = smov %s1058_s25  ;;  %s1267_s15 = smov %s972_s16 }
 0x172   : > { %s1268_s16 = smov %s1270_s20  ;;  %16 = sbr.rel (!%p14_p6) target bundleno = 5 (0x5), region = 74 }
 0x179   :  { %600 = vsyncpa [#allocation3], 1 }
 0x17a   :  { %602 = vsyncpa [#allocation3 + $0x1], 1 }
 0x17b   :  { %603 = vsyncpa [#allocation4], 1 }
 0x17c   :  { %605 = vsyncpa [#allocation4 + $0x1], 1 }

</bundles_post_ra>
